<compile_context>
chip_gen: v5e
topology: v5e:2x2
jax: 0.10.0
libtpu: 0.0.40
codegen_flags: <defaults>
</compile_context>

<pallas_src>
import jax
import jax.numpy as jnp
from jax.experimental import pallas as pl
from jax.experimental.pallas import tpu as pltpu

HIDDEN = 64
STONE_NUM = 5
IN_FEATURES = STONE_NUM * 4      # 20
K_PAD = 32                       # padded input-feature dim (zero-padded 20 -> 32)
H_FUSED = 2 * HIDDEN             # 128 = [state hidden | advantage hidden]
N_PAD = 128                      # cols [0,n_action)=adv, 126=mean(adv), 127=V
SUBLANE = 8
MAX_TB = 1024                    # batch tile for large batches (multiple of 256)


def _dueling_kernel(x_ref, w1_ref, b1_ref, w2_ref, b2_ref, out_ref):
    # Layer 1 (state || advantage): (TB,32)bf16 @ (32,128)bf16 -> f32 acc; bias+ReLU in f32.
    h = jnp.dot(x_ref[...], w1_ref[...], preferred_element_type=jnp.float32) + b1_ref[...]
    h = jnp.maximum(h, 0.0)

    # Fused layer 2: (TB,128)bf16 @ (128,128)bf16 -> f32 acc; bias in f32.
    y = (jnp.dot(h.astype(jnp.bfloat16), w2_ref[...],
                 preferred_element_type=jnp.float32) + b2_ref[...])

    v = y[:, N_PAD - 1:N_PAD]              # (TB, 1) state value (col 127)
    adv_mean = y[:, N_PAD - 2:N_PAD - 1]   # (TB, 1) mean advantage (folded MXU col 126)

    # Real Q-values land in cols [0, n_action); store the full lane-dense slab.
    out_ref[...] = v + y - adv_mean


def pack_params(params, n_action):
    """Fuse raw per-layer params into 4 kernel operands: W1(bf16), b1(f32), W2(bf16), b2(f32)."""
    (w1s, b1s, w2s, b2s, w1a, b1a, w2a, b2a) = params

    # Fused layer-1 weight, K zero-padded 20 -> 32.
    w1 = jnp.zeros((K_PAD, H_FUSED), jnp.float32)
    w1 = w1.at[:IN_FEATURES, :HIDDEN].set(w1s)
    w1 = w1.at[:IN_FEATURES, HIDDEN:].set(w1a)
    b1 = jnp.concatenate([b1s.reshape(1, HIDDEN), b1a.reshape(1, HIDDEN)], axis=1)

    # Fused block-diagonal layer-2 weight:
    #   cols [0, n_action) <- advantage head, col 126 <- advantage-mean column, col 127 <- V.
    w2 = jnp.zeros((H_FUSED, N_PAD), jnp.float32)
    w2 = w2.at[HIDDEN:, :n_action].set(w2a)
    w2 = w2.at[HIDDEN:, N_PAD - 2].set(jnp.sum(w2a, axis=1) / n_action)
    w2 = w2.at[:HIDDEN, N_PAD - 1].set(w2s.reshape(-1))

    b2 = jnp.zeros((1, N_PAD), jnp.float32)
    b2 = b2.at[0, :n_action].set(b2a.reshape(-1))
    b2 = b2.at[0, N_PAD - 2].set(jnp.mean(b2a))
    b2 = b2.at[0, N_PAD - 1].set(b2s.reshape(-1)[0])

    return w1.astype(jnp.bfloat16), b1, w2.astype(jnp.bfloat16), b2


def dueling_qnet_forward(obs, fused_params, n_action):
    """obs: (B, STONE_NUM, 4) -> (B, n_action) float32 Q-values."""
    w1, b1, w2, b2 = fused_params
    B = obs.shape[0]

    # Batch tile: fill the MXU for big batches, round small batches to the sublane.
    if B <= MAX_TB:
        TB = max(SUBLANE, ((B + SUBLANE - 1) // SUBLANE) * SUBLANE)
    else:
        TB = MAX_TB
    Bp = ((B + TB - 1) // TB) * TB
    grid = (Bp // TB,)

    # Flatten (matches obs.view(B, -1)); one fused pad does batch B->Bp and K 20->32.
    x = obs.reshape(B, -1).astype(jnp.bfloat16)
    x_pad = jnp.pad(x, ((0, Bp - B), (0, K_PAD - IN_FEATURES)))

    flops = 2 * Bp * (K_PAD * H_FUSED + H_FUSED * N_PAD)
    bytes_accessed = (2 * (x_pad.size + w1.size + w2.size)
                      + 4 * (b1.size + b2.size + Bp * N_PAD))

    out_padded = pl.pallas_call(
        _dueling_kernel,
        out_shape=jax.ShapeDtypeStruct((Bp, N_PAD), jnp.float32),
        grid=grid,
        in_specs=[
            pl.BlockSpec((TB, K_PAD), lambda i: (i, 0)),        # x: tiled along batch
            pl.BlockSpec((K_PAD, H_FUSED), lambda i: (0, 0)),   # w1: VMEM-resident
            pl.BlockSpec((1, H_FUSED), lambda i: (0, 0)),       # b1
            pl.BlockSpec((H_FUSED, N_PAD), lambda i: (0, 0)),   # w2
            pl.BlockSpec((1, N_PAD), lambda i: (0, 0)),         # b2
        ],
        out_specs=pl.BlockSpec((TB, N_PAD), lambda i: (i, 0)),
        compiler_params=pltpu.CompilerParams(
            dimension_semantics=("parallel",)),                 # 2x on v7x dual-TC
        cost_estimate=pl.CostEstimate(
            flops=flops, transcendentals=0, bytes_accessed=bytes_accessed),
    )(x_pad, w1, b1, w2, b2)

    # TODO(synk): for the act() hot path, consumers could take the argmax in-kernel
    # instead of materializing this non-lane-dense slice.
    return out_padded[:B, :n_action]


def init_params(key, n_action):
    """Deterministic parameter init (shapes match the PyTorch module, stored as (in, out))."""
    ks = jax.random.split(key, 8)

    def linear(kw, kb, fan_in, fan_out):
        bound = 1.0 / jnp.sqrt(fan_in)
        w = jax.random.uniform(kw, (fan_in, fan_out), jnp.float32, -bound, bound)
        b = jax.random.uniform(kb, (1, fan_out), jnp.float32, -bound, bound)
        return w, b

    w1s, b1s = linear(ks[0], ks[1], IN_FEATURES, HIDDEN)
    w2s, b2s = linear(ks[2], ks[3], HIDDEN, 1)
    w1a, b1a = linear(ks[4], ks[5], IN_FEATURES, HIDDEN)
    w2a, b2a = linear(ks[6], ks[7], HIDDEN, n_action)
    return (w1s, b1s, w2s, b2s, w1a, b1a, w2a, b2a)


def reference_forward(obs, params):
    """Pure-JAX f32 reference mirroring the PyTorch forward exactly."""
    B = obs.shape[0]
    x = obs.reshape(B, -1).astype(jnp.float32)
    (w1s, b1s, w2s, b2s, w1a, b1a, w2a, b2a) = params
    state_val = jnp.maximum(x @ w1s + b1s, 0.0) @ w2s + b2s
    adv = jnp.maximum(x @ w1a + b1a, 0.0) @ w2a + b2a
    return state_val + adv - jnp.mean(adv, axis=1, keepdims=True)


if __name__ == "__main__":
    B = 8
    N_ACTION = 27  # consistent with act(): theta = action // 9 ..., velocity = action % 9 ...

    key = jax.random.PRNGKey(0)
    k_obs, k_par = jax.random.split(key)

    obs = jax.random.normal(k_obs, (B, STONE_NUM, 4), dtype=jnp.float32)
    params = init_params(k_par, N_ACTION)
    fused_params = pack_params(params, N_ACTION)

    q_kernel = dueling_qnet_forward(obs, fused_params, N_ACTION)
    q_kernel = jax.block_until_ready(q_kernel)

    q_ref = reference_forward(obs, params)
    assert q_kernel.shape == (B, N_ACTION)
    # bf16 matmul operands with f32 accumulation -> loosened tolerance vs. f32 reference.
    assert jnp.allclose(q_kernel, q_ref, atol=2e-2, rtol=2e-2), "mismatch vs reference"

    print("KERNEL_OK")
</pallas_src>

<mosaic_0001>
module attributes {stable_mosaic.version = 11 : i64} {
  func.func @_dueling_kernel(%arg0: i32, %arg1: memref<8x32xbf16, #tpu.memory_space<vmem>>, %arg2: memref<32x128xbf16, #tpu.memory_space<vmem>>, %arg3: memref<1x128xf32, #tpu.memory_space<vmem>>, %arg4: memref<128x128xbf16, #tpu.memory_space<vmem>>, %arg5: memref<1x128xf32, #tpu.memory_space<vmem>>, %arg6: memref<8x128xf32, #tpu.memory_space<vmem>>) attributes {dimension_semantics = [#tpu.dimension_semantics<parallel>], iteration_bounds = array<i64: 1>, scalar_prefetch = 0 : i64, scratch_operands = 0 : i64, tpu.core_type = #tpu.core_type<tc>, window_params = [{transform_indices = @transform_0, window_bounds = array<i64: 8, 32>}, {pipeline_mode = #tpu.pipeline_mode<synchronous>, transform_indices = @transform_1, window_bounds = array<i64: 32, 128>}, {pipeline_mode = #tpu.pipeline_mode<synchronous>, transform_indices = @transform_2, window_bounds = array<i64: 1, 128>}, {pipeline_mode = #tpu.pipeline_mode<synchronous>, transform_indices = @transform_3, window_bounds = array<i64: 128, 128>}, {pipeline_mode = #tpu.pipeline_mode<synchronous>, transform_indices = @transform_4, window_bounds = array<i64: 1, 128>}, {transform_indices = @transform_5, window_bounds = array<i64: 8, 128>}]} {
    %c0 = arith.constant 0 : index
    %c0_0 = arith.constant 0 : index
    %0 = vector.load %arg1[%c0, %c0_0] : memref<8x32xbf16, #tpu.memory_space<vmem>>, vector<8x32xbf16>
    %c0_1 = arith.constant 0 : index
    %c0_2 = arith.constant 0 : index
    %1 = vector.load %arg2[%c0_1, %c0_2] : memref<32x128xbf16, #tpu.memory_space<vmem>>, vector<32x128xbf16>
    %cst = arith.constant dense<0.000000e+00> : vector<8x128xf32>
    %2 = tpu.matmul %0, %1, %cst {dimension_numbers = #tpu.dot_dimension_numbers<[1], [0], [0], [1], [0, 0, 1, 1], [], []>} : vector<8x32xbf16>, vector<32x128xbf16>, vector<8x128xf32> -> vector<8x128xf32>
    %c0_3 = arith.constant 0 : index
    %c0_4 = arith.constant 0 : index
    %3 = vector.load %arg3[%c0_3, %c0_4] : memref<1x128xf32, #tpu.memory_space<vmem>>, vector<1x128xf32>
    %4 = vector.broadcast %3 : vector<1x128xf32> to vector<8x128xf32>
    %5 = arith.addf %2, %4 : vector<8x128xf32>
    %cst_5 = arith.constant 0.000000e+00 : f32
    %6 = vector.broadcast %cst_5 : f32 to vector<8x128xf32>
    %7 = arith.maximumf %5, %6 : vector<8x128xf32>
    %8 = arith.truncf %7 : vector<8x128xf32> to vector<8x128xbf16>
    %c0_6 = arith.constant 0 : index
    %c0_7 = arith.constant 0 : index
    %9 = vector.load %arg4[%c0_6, %c0_7] : memref<128x128xbf16, #tpu.memory_space<vmem>>, vector<128x128xbf16>
    %cst_8 = arith.constant dense<0.000000e+00> : vector<8x128xf32>
    %10 = tpu.matmul %8, %9, %cst_8 {dimension_numbers = #tpu.dot_dimension_numbers<[1], [0], [0], [1], [0, 0, 1, 1], [], []>} : vector<8x128xbf16>, vector<128x128xbf16>, vector<8x128xf32> -> vector<8x128xf32>
    %c0_9 = arith.constant 0 : index
    %c0_10 = arith.constant 0 : index
    %11 = vector.load %arg5[%c0_9, %c0_10] : memref<1x128xf32, #tpu.memory_space<vmem>>, vector<1x128xf32>
    %12 = vector.broadcast %11 : vector<1x128xf32> to vector<8x128xf32>
    %13 = arith.addf %10, %12 : vector<8x128xf32>
    %14 = vector.extract_strided_slice %13 {offsets = [0, 127], sizes = [8, 1], strides = [1, 1]} : vector<8x128xf32> to vector<8x1xf32>
    %15 = vector.extract_strided_slice %13 {offsets = [0, 126], sizes = [8, 1], strides = [1, 1]} : vector<8x128xf32> to vector<8x1xf32>
    %16 = vector.broadcast %14 : vector<8x1xf32> to vector<8x128xf32>
    %17 = arith.addf %16, %13 : vector<8x128xf32>
    %18 = vector.broadcast %15 : vector<8x1xf32> to vector<8x128xf32>
    %19 = arith.subf %17, %18 : vector<8x128xf32>
    %c0_11 = arith.constant 0 : index
    %c0_12 = arith.constant 0 : index
    %20 = vector.load %arg6[%c0_11, %c0_12] : memref<8x128xf32, #tpu.memory_space<vmem>>, vector<8x128xf32>
    tpu.vector_store %arg6[%c0_11, %c0_12], %19 {strides = array<i32>} : memref<8x128xf32, #tpu.memory_space<vmem>>, vector<8x128xf32>,
    return
  }
  func.func @transform_0(%arg0: i32) -> (i32, i32) {
    %c0_i32 = arith.constant 0 : i32
    %c0_i32_0 = arith.constant 0 : i32
    return %arg0, %c0_i32 : i32, i32
  }
  func.func @transform_1(%arg0: i32) -> (i32, i32) {
    %c0_i32 = arith.constant 0 : i32
    %c0_i32_0 = arith.constant 0 : i32
    %c0_i32_1 = arith.constant 0 : i32
    return %c0_i32, %c0_i32_0 : i32, i32
  }
  func.func @transform_2(%arg0: i32) -> (i32, i32) {
    %c0_i32 = arith.constant 0 : i32
    %c0_i32_0 = arith.constant 0 : i32
    %c0_i32_1 = arith.constant 0 : i32
    return %c0_i32, %c0_i32_0 : i32, i32
  }
  func.func @transform_3(%arg0: i32) -> (i32, i32) {
    %c0_i32 = arith.constant 0 : i32
    %c0_i32_0 = arith.constant 0 : i32
    %c0_i32_1 = arith.constant 0 : i32
    return %c0_i32, %c0_i32_0 : i32, i32
  }
  func.func @transform_4(%arg0: i32) -> (i32, i32) {
    %c0_i32 = arith.constant 0 : i32
    %c0_i32_0 = arith.constant 0 : i32
    %c0_i32_1 = arith.constant 0 : i32
    return %c0_i32, %c0_i32_0 : i32, i32
  }
  func.func @transform_5(%arg0: i32) -> (i32, i32) {
    %c0_i32 = arith.constant 0 : i32
    %c0_i32_0 = arith.constant 0 : i32
    return %arg0, %c0_i32 : i32, i32
  }
}

</mosaic_0001>

<bundles_post_ra>
// kernel: tpu_custom_call.1
= control target key start
LH: loop header
LB: loop body
LE: loop exit
PB: predicated region body
PF: predicated region fallthrough
CT: control target
= control target key end

     0   :  { %10 = vsyncpa [#allocation3], 0  ;;  %s439_s0 = inlined_call_operand.hbm [shape: bf16[8,32], index: 0, kind: input, shape index: {}]   ;;  %s440_s1 = inlined_call_operand.hbm [shape: bf16[32,128], index: 1, kind: input, shape index: {}]   ;;  %s441_s2 = inlined_call_operand.vmem [shape: f32[1,128], index: 2, kind: input, shape index: {}]   ;;  %s442_s3 = inlined_call_operand.hbm [shape: bf16[128,128], index: 3, kind: input, shape index: {}]   ;;  %s443_s4 = inlined_call_operand.vmem [shape: f32[1,128], index: 4, kind: input, shape index: {}]   ;;  %s444_s5 = inlined_call_operand.hbm [shape: f32[8,128], index: 5, kind: output, shape index: {}]  }
   0x1   :  { %11 = vsyncpa [#allocation6], 0  ;;  %s28_s20 = sshll.u32 %s440_s1, 4  ;;  %s29_s20 = int_to_ptr.hbm [resolvable:$true] %s28_s20 }
   0x2   :  { %12 = vsyncpa [#allocation4], 0  ;;  %s383_s21 = smov [#allocation5]   ;;  %s18_s25 = sshll.u32 %s439_s0, 4  ;;  %s19_s25 = int_to_ptr.hbm [resolvable:$true] %s18_s25 }
   0x3   :  { %s30_s22 = sshll.u32 %s383_s21, 4  ;;  %s384_s26 = smov 64   ;;  %s31_s22 = int_to_ptr.vmem [resolvable:$true] %s30_s22 }
   0x4   :  { %s385_s27 = smov 4   ;;  %s386_s28 = smov [#allocation2]  }
   0x5   :  { %36 = dma.hbm_to_vmem [thread:$0]  %s29_s20, 256, %s31_s22, [#allocation6], %s384_s26, %s384_s26, %s385_s27  }
   0x6   :  { %s20_s29 = sshll.u32 %s386_s28, 4  ;;  %s43_s7 = sshll.u32 %s442_s3, 4  ;;  %s21_s29 = int_to_ptr.vmem [resolvable:$true] %s20_s29  ;;  %s44_s7 = int_to_ptr.hbm [resolvable:$true] %s43_s7 }
   0x7   :  { %23 = dma.hbm_to_vmem [thread:$0]  %s19_s25, 64, %s21_s29, [#allocation3]  }
   0x8   :  { %s387_s1 = smov [#allocation7]  }
   0x9   :  { %s45_s8 = sshll.u32 %s387_s1, 4  ;;  %s46_s8 = int_to_ptr.vmem [resolvable:$true] %s45_s8 }
   0xa   :  { %51 = dma.hbm_to_vmem [thread:$0]  %s44_s7, 1024, %s46_s8, [#allocation6], %s384_s26, %s384_s26, %s385_s27  }
   0xb   :  { %377 = dma.done.wait [#allocation3], 64  }
   0xc   :  { %378 = vsyncadd [#allocation3], 4294967232 }
   0xd   :  { %379 = dma.done.wait [#allocation6], 1280  }
   0xe   :  { %380 = vsyncadd [#allocation6], 4294966016  ;;  %v260_v0 = vld [vmem:[#allocation5 + $0x8] sm:$0xff]  ;;  %v259_v2 = vld [vmem:[#allocation5] sm:$0xff]  ;;  %vm88_vm0 = vcmask 261120   ;;  %v388_v17 = vmov 127  }
   0xf   :  { %v268_v1 = vld [vmem:[#allocation7 + $0x38] sm:$0xff]  ;;  %98 = vmatpush.bf16.msra.mxu0 %v260_v0  ;;  %v267_v3 = vld [vmem:[#allocation7 + $0x30] sm:$0xff]  ;;  %v67_v4 = vld [vmem:[#allocation2] sm:$0xf]  ;;  %277 = vset.pattern.permute.xlu0 %v388_v17  ;;  %v389_v22 = vmov 126   ;;  %s207_s14 = sshll.u32 %s444_s5, 4  ;;  %s208_s14 = int_to_ptr.hbm [resolvable:$true] %s207_s14 }
  0x10   :  { %175 = vmatpush.bf16.msra.mxu1 %v268_v1  ;;  %v266_v5 = vld [vmem:[#allocation7 + $0x28] sm:$0xff]  ;;  %v265_v6 = vld [vmem:[#allocation7 + $0x20] sm:$0xff]  ;;  %v264_v7 = vld [vmem:[#allocation7 + $0x18] sm:$0xff] }
  0x11   :  { %v263_v8 = vld [vmem:[#allocation7 + $0x10] sm:$0xff]  ;;  %v262_v9 = vld [vmem:[#allocation7 + $0x8] sm:$0xff]  ;;  %v261_v10 = vld [vmem:[#allocation7] sm:$0xff] }
  0x12   :  { %v279_v11 = vld [vmem:[%s441_s2] ss:$0 sm:$0xff]  ;;  %s390_s2 = smov [#allocation8]  }
  0x13   :  { %99 = vmatpush.bf16.msra.mxu0 %v259_v2  ;;  %v280_v18 = vld [vmem:[%s443_s4] ss:$0 sm:$0xff]  ;;  %s205_s11 = sshll.u32 %s390_s2, 4  ;;  %s206_s11 = int_to_ptr.vmem [resolvable:$true] %s205_s11 }
  0x14   :  { %176 = vmatpush.bf16.msra.mxu1 %v267_v3 }
  0x16   :  { %226 = vmatmul.msk.bf16.vlgmr.msra.gmra.mxu0 %vm88_vm0, %v67_v4 }
  0x18   :  { %177 = vmatpush.bf16.msra.mxu1 %v266_v5 }
  0x1c   :  { %178 = vmatpush.bf16.msra.mxu1 %v265_v6 }
  0x20   :  { %179 = vmatpush.bf16.msra.mxu1 %v264_v7 }
  0x24   :  { %180 = vmatpush.bf16.msra.mxu1 %v263_v8 }
  0x28   :  { %181 = vmatpush.bf16.msra.mxu1 %v262_v9 }
  0x2c   :  { %182 = vmatpush.bf16.msra.mxu1 %v261_v10 }
  0x93   :  { %v101_v12 = vpop.f32.mrf.mxu0 }
  0x94   :  { %v102_v13 = vadd.f32 %v279_v11, %v101_v12 }
  0x96   :  { %v105_v14 = vmax.f32 %v102_v13, 0.0 }
  0x98   :  { %v106_v15 = vpack.c.bf16 %v105_v14, %v105_v14 }
  0x9a   :  { %183 = vmatmul.bf16.vlgmr.msra.gmra.mxu1 %v106_v15 }
  0x9b   :  { %v103_v16 = vpop.f32.mrf.mxu0 }
 0x117   :  { %v184_v19 = vpop.f32.mrf.mxu1 }
 0x118   :  { %v185_v20 = vadd.f32 %v280_v18, %v184_v19 }
 0x11a   :  { %190 = vperm.xlu0 %277, %v185_v20  }
 0x11f   :  { %v186_v21 = vpop.f32.mrf.mxu1 }
 0x122   :  { %278 = vset.pattern.permute.xlu0 %v389_v22 }
 0x123   :  { %195 = vperm.xlu0 %278, %v185_v20  }
 0x18c   :  { %v191_v23 = vpop.permute.xlu0 %190 }
 0x18d   :  { %v193_v24 = vadd.f32 %v191_v23, %v185_v20 }
 0x195   :  { %v196_v25 = vpop.permute.xlu0 %195 }
 0x196   :  { %v198_v26 = vsub.f32 %v193_v24, %v196_v25 }
 0x198   :  { %199 = vst [vmem:[#allocation8] sm:$0xff] %v198_v26 }
 0x199   :  { %210 = dma.vmem_to_hbm [thread:$0]  %s206_s11, 128, %s208_s14, [#allocation4]  }
 0x19a   :  { %381 = dma.done.wait [#allocation4], 128  }
 0x19b   :  { %382 = vsyncadd [#allocation4], 4294967168 }
 0x19c   :  { %215 = vsyncpa [#allocation3], 1 }
 0x19d   :  { %216 = vsyncpa [#allocation6], 1 }
 0x19e   :  { %217 = vsyncpa [#allocation4], 1 }

</bundles_post_ra>
